<compile_context>
chip_gen: v6e
topology: v6e:2x2x1
jax: 0.10.0
libtpu: 0.0.40
codegen_flags: <defaults>
</compile_context>

<pallas_src>
import functools

import jax
import jax.numpy as jnp
from jax import lax
from jax.experimental import pallas as pl
from jax.experimental.pallas import tpu as pltpu

LANE = 128


def _round_up(x, m):
    return ((x + m - 1) // m) * m


def encoder_kernel(x_ref, w1_ref, b1_ref, w2_ref, b2_ref, w3_ref, b3_ref, o_ref,
                   *, precision):
    """One batch tile; batch is on the lane (last) axis.

    x_ref : (input_dim, TB)          wN_ref: (out_features, in_features)
    bN_ref: (out_features, 1) f32    o_ref : (output_dim, TB)
    """
    x = x_ref[...]
    # fc1 + ReLU (MXU matmul, f32 accumulation; bias/ReLU in f32 on the VPU)
    h = jnp.dot(w1_ref[...], x, preferred_element_type=jnp.float32, precision=precision)
    h = jnp.maximum(h + b1_ref[...], 0.0)
    # fc2 + ReLU
    h = jnp.dot(w2_ref[...], h.astype(w2_ref.dtype),
                preferred_element_type=jnp.float32, precision=precision)
    h = jnp.maximum(h + b2_ref[...], 0.0)
    # fc3 (no activation)
    h = jnp.dot(w3_ref[...], h.astype(w3_ref.dtype),
                preferred_element_type=jnp.float32, precision=precision)
    o_ref[...] = (h + b3_ref[...]).astype(o_ref.dtype)


def encoder_forward_fm(x_fm, params, *, block_batch=4096, out_dtype=jnp.float32,
                       precision=None):
    """Feature-major entry point (preferred: no wrapper transposes).

    x_fm: (input_dim, batch) -> (output_dim, batch).
    """
    w1, b1, w2, b2, w3, b3 = params
    input_dim, batch = x_fm.shape
    d1, d2, out_dim = w1.shape[0], w2.shape[0], w3.shape[0]

    # Cast matmul inputs to the weight dtype (bf16 path halves the obs DMA stream).
    x = x_fm.astype(w1.dtype)

    # --- Batch tiling: always lane-dense (multiple of 128) and >= 2 grid steps when
    # the batch allows it, so both v7x TensorCores get work under "parallel".
    padded = _round_up(batch, LANE)
    tb = min(block_batch, padded)
    if padded // tb < 2 and padded >= 2 * LANE:
        tb = _round_up(pl.cdiv(padded, 2), LANE)
    padded = _round_up(padded, tb)              # make the grid cover exactly
    if padded != batch:
        x = jnp.pad(x, ((0, 0), (0, padded - batch)))
    grid = (padded // tb,)

    # Weights/biases: full-array blocks with constant index_map -> resident in VMEM.
    full = lambda a: pl.BlockSpec(a.shape, lambda i: (0, 0))

    # --- VMEM budget: double-buffered streamed tiles + resident params + f32 activations.
    in_bytes = x.dtype.itemsize
    out_bytes = jnp.dtype(out_dtype).itemsize
    per_col = 2 * input_dim * in_bytes + 2 * out_dim * out_bytes + 4 * (d1 + d2)
    param_bytes = sum(int(p.size * p.dtype.itemsize) for p in params)
    vmem_est = tb * per_col + param_bytes
    # >= 32 MiB (beats v5e's 16 MiB scoped default), <= 64 MiB (v7x physical), 2x headroom.
    vmem_limit = int(min(64 * 1024 * 1024, max(32 * 1024 * 1024, 2 * vmem_est)))

    flops = 2 * batch * (input_dim * d1 + d1 * d2 + d2 * out_dim)
    bytes_accessed = int(batch * input_dim * in_bytes
                         + batch * out_dim * out_bytes
                         + param_bytes)

    out_fm = pl.pallas_call(
        functools.partial(encoder_kernel, precision=precision),
        out_shape=jax.ShapeDtypeStruct((out_dim, padded), out_dtype),
        grid=grid,
        in_specs=[
            pl.BlockSpec((input_dim, tb), lambda i: (0, i)),   # streamed obs tile
            full(w1), full(b1), full(w2), full(b2), full(w3), full(b3),
        ],
        out_specs=pl.BlockSpec((out_dim, tb), lambda i: (0, i)),  # lane-dense store
        compiler_params=pltpu.CompilerParams(
            dimension_semantics=("parallel",),     # v7x: shard batch tiles over 2 TCs
            vmem_limit_bytes=vmem_limit),
        cost_estimate=pl.CostEstimate(
            flops=flops, transcendentals=0, bytes_accessed=bytes_accessed),
    )(x, w1, b1, w2, b2, w3, b3)

    return out_fm[:, :batch]


def encoder_forward(obs, params, *, block_batch=4096, out_dtype=jnp.float32,
                    precision=None):
    """(batch, input_dim) -> (batch, output_dim). Matches PyTorch Encoder.forward.

    The two transposes here are pure layout plumbing around the feature-major kernel.
    In production, keep activations feature-major end-to-end and call
    `encoder_forward_fm` directly so no extra HBM read+write per transpose is paid.
    """
    out_fm = encoder_forward_fm(obs.T, params, block_batch=block_batch,
                                out_dtype=out_dtype, precision=precision)
    return out_fm.T


def init_params(key, input_dim, hidden_dim, output_dim, param_dtype=jnp.float32):
    """PyTorch-style nn.Linear init (uniform +-1/sqrt(fan_in)).
    Weights: (out_features, in_features) [PyTorch layout]; biases: (out_features, 1), f32."""
    dims = [(input_dim, 2 * hidden_dim), (2 * hidden_dim, hidden_dim), (hidden_dim, output_dim)]
    params = []
    for fan_in, fan_out in dims:
        key, kw, kb = jax.random.split(key, 3)
        bound = float(fan_in) ** -0.5
        w = jax.random.uniform(kw, (fan_out, fan_in), jnp.float32, -bound, bound)
        b = jax.random.uniform(kb, (fan_out, 1), jnp.float32, -bound, bound)
        params += [w.astype(param_dtype), b]                  # bias stays f32 (VPU epilogue)
    return tuple(params)


def encoder_reference(obs, params):
    w1, b1, w2, b2, w3, b3 = params
    w1, w2, w3 = (w.astype(jnp.float32) for w in (w1, w2, w3))
    obs32 = obs.astype(w1.dtype) if w1.dtype == jnp.float32 else obs
    h = jnp.maximum(obs32 @ w1.T + b1.T, 0.0)
    h = jnp.maximum(h @ w2.T + b2.T, 0.0)
    return h @ w3.T + b3.T


if __name__ == "__main__":
    # CartPole-ish shapes: obs dim 4, hidden 32 (fc1 out = 64, fc2 out = 32), output 16.
    input_dim, hidden_dim, output_dim = 4, 32, 16
    batch = 256  # multiple of 128; with the >=2-step rule this exercises a 2-step grid

    key = jax.random.PRNGKey(0)
    key, kobs = jax.random.split(key)
    obs = jax.random.normal(kobs, (batch, input_dim), jnp.float32)

    # f32 path, bit-faithful to the PyTorch module (explicit HIGHEST matmul precision).
    params = init_params(key, input_dim, hidden_dim, output_dim)
    out = jax.block_until_ready(
        encoder_forward(obs, params, precision=lax.Precision.HIGHEST))
    ref = encoder_reference(obs, params)
    assert out.shape == (batch, output_dim)
    assert jnp.allclose(out, ref, atol=1e-5, rtol=1e-5)

    # Feature-major entry point (no wrapper transposes) gives identical results.
    out_fm = jax.block_until_ready(
        encoder_forward_fm(obs.T, params, precision=lax.Precision.HIGHEST))
    assert out_fm.shape == (output_dim, batch)
    assert jnp.allclose(out_fm.T, ref, atol=1e-5, rtol=1e-5)

    # bf16 weights/obs + bf16 output (recommended default on v5e; halves HBM streams).
    # NOTE: activations are intentionally cast to bf16 before each matmul (f32 accumulation
    # is kept via preferred_element_type) -- a deliberate speed/precision trade-off.
    params_bf16 = init_params(key, input_dim, hidden_dim, output_dim,
                              param_dtype=jnp.bfloat16)
    out_bf16 = jax.block_until_ready(
        encoder_forward(obs, params_bf16, out_dtype=jnp.bfloat16))
    ref_bf16 = encoder_reference(obs, params_bf16)
    assert out_bf16.dtype == jnp.bfloat16
    assert jnp.allclose(out_bf16.astype(jnp.float32), ref_bf16, atol=5e-2, rtol=5e-2)

    print("KERNEL_OK")
</pallas_src>

<mosaic_0001>
module attributes {stable_mosaic.version = 11 : i64} {
  func.func @encoder_kernel(%arg0: i32, %arg1: memref<4x128xf32, #tpu.memory_space<vmem>>, %arg2: memref<64x4xf32, #tpu.memory_space<vmem>>, %arg3: memref<64x1xf32, #tpu.memory_space<vmem>>, %arg4: memref<32x64xf32, #tpu.memory_space<vmem>>, %arg5: memref<32x1xf32, #tpu.memory_space<vmem>>, %arg6: memref<16x32xf32, #tpu.memory_space<vmem>>, %arg7: memref<16x1xf32, #tpu.memory_space<vmem>>, %arg8: memref<16x128xf32, #tpu.memory_space<vmem>>) attributes {dimension_semantics = [#tpu.dimension_semantics<parallel>], iteration_bounds = array<i64: 2>, scalar_prefetch = 0 : i64, scratch_operands = 0 : i64, tpu.core_type = #tpu.core_type<tc>, window_params = [{transform_indices = @transform_0, window_bounds = array<i64: 4, 128>}, {pipeline_mode = #tpu.pipeline_mode<synchronous>, transform_indices = @transform_1, window_bounds = array<i64: 64, 4>}, {pipeline_mode = #tpu.pipeline_mode<synchronous>, transform_indices = @transform_2, window_bounds = array<i64: 64, 1>}, {pipeline_mode = #tpu.pipeline_mode<synchronous>, transform_indices = @transform_3, window_bounds = array<i64: 32, 64>}, {pipeline_mode = #tpu.pipeline_mode<synchronous>, transform_indices = @transform_4, window_bounds = array<i64: 32, 1>}, {pipeline_mode = #tpu.pipeline_mode<synchronous>, transform_indices = @transform_5, window_bounds = array<i64: 16, 32>}, {pipeline_mode = #tpu.pipeline_mode<synchronous>, transform_indices = @transform_6, window_bounds = array<i64: 16, 1>}, {transform_indices = @transform_7, window_bounds = array<i64: 16, 128>}]} {
    %c0 = arith.constant 0 : index
    %c0_0 = arith.constant 0 : index
    %0 = vector.load %arg1[%c0, %c0_0] : memref<4x128xf32, #tpu.memory_space<vmem>>, vector<4x128xf32>
    %c0_1 = arith.constant 0 : index
    %c0_2 = arith.constant 0 : index
    %1 = vector.load %arg2[%c0_1, %c0_2] : memref<64x4xf32, #tpu.memory_space<vmem>>, vector<64x4xf32>
    %cst = arith.constant dense<0.000000e+00> : vector<64x128xf32>
    %2 = tpu.matmul %1, %0, %cst {dimension_numbers = #tpu.dot_dimension_numbers<[1], [0], [0], [1], [0, 0, 1, 1], [], []>, precision = #tpu.contract_precision<fp32>} : vector<64x4xf32>, vector<4x128xf32>, vector<64x128xf32> -> vector<64x128xf32>
    %c0_3 = arith.constant 0 : index
    %c0_4 = arith.constant 0 : index
    %3 = vector.load %arg3[%c0_3, %c0_4] : memref<64x1xf32, #tpu.memory_space<vmem>>, vector<64x1xf32>
    %4 = vector.broadcast %3 : vector<64x1xf32> to vector<64x128xf32>
    %5 = arith.addf %2, %4 : vector<64x128xf32>
    %cst_5 = arith.constant 0.000000e+00 : f32
    %6 = vector.broadcast %cst_5 : f32 to vector<64x128xf32>
    %7 = arith.maximumf %5, %6 : vector<64x128xf32>
    %c0_6 = arith.constant 0 : index
    %c0_7 = arith.constant 0 : index
    %8 = vector.load %arg4[%c0_6, %c0_7] : memref<32x64xf32, #tpu.memory_space<vmem>>, vector<32x64xf32>
    %cst_8 = arith.constant dense<0.000000e+00> : vector<32x128xf32>
    %9 = tpu.matmul %8, %7, %cst_8 {dimension_numbers = #tpu.dot_dimension_numbers<[1], [0], [0], [1], [0, 0, 1, 1], [], []>, precision = #tpu.contract_precision<fp32>} : vector<32x64xf32>, vector<64x128xf32>, vector<32x128xf32> -> vector<32x128xf32>
    %c0_9 = arith.constant 0 : index
    %c0_10 = arith.constant 0 : index
    %10 = vector.load %arg5[%c0_9, %c0_10] : memref<32x1xf32, #tpu.memory_space<vmem>>, vector<32x1xf32>
    %11 = vector.broadcast %10 : vector<32x1xf32> to vector<32x128xf32>
    %12 = arith.addf %9, %11 : vector<32x128xf32>
    %cst_11 = arith.constant 0.000000e+00 : f32
    %13 = vector.broadcast %cst_11 : f32 to vector<32x128xf32>
    %14 = arith.maximumf %12, %13 : vector<32x128xf32>
    %c0_12 = arith.constant 0 : index
    %c0_13 = arith.constant 0 : index
    %15 = vector.load %arg6[%c0_12, %c0_13] : memref<16x32xf32, #tpu.memory_space<vmem>>, vector<16x32xf32>
    %cst_14 = arith.constant dense<0.000000e+00> : vector<16x128xf32>
    %16 = tpu.matmul %15, %14, %cst_14 {dimension_numbers = #tpu.dot_dimension_numbers<[1], [0], [0], [1], [0, 0, 1, 1], [], []>, precision = #tpu.contract_precision<fp32>} : vector<16x32xf32>, vector<32x128xf32>, vector<16x128xf32> -> vector<16x128xf32>
    %c0_15 = arith.constant 0 : index
    %c0_16 = arith.constant 0 : index
    %17 = vector.load %arg7[%c0_15, %c0_16] : memref<16x1xf32, #tpu.memory_space<vmem>>, vector<16x1xf32>
    %18 = vector.broadcast %17 : vector<16x1xf32> to vector<16x128xf32>
    %19 = arith.addf %16, %18 : vector<16x128xf32>
    %c0_17 = arith.constant 0 : index
    %c0_18 = arith.constant 0 : index
    %20 = vector.load %arg8[%c0_17, %c0_18] : memref<16x128xf32, #tpu.memory_space<vmem>>, vector<16x128xf32>
    tpu.vector_store %arg8[%c0_17, %c0_18], %19 {strides = array<i32>} : memref<16x128xf32, #tpu.memory_space<vmem>>, vector<16x128xf32>,
    return
  }
  func.func @transform_0(%arg0: i32) -> (i32, i32) {
    %c0_i32 = arith.constant 0 : i32
    %c0_i32_0 = arith.constant 0 : i32
    return %c0_i32, %arg0 : i32, i32
  }
  func.func @transform_1(%arg0: i32) -> (i32, i32) {
    %c0_i32 = arith.constant 0 : i32
    %c0_i32_0 = arith.constant 0 : i32
    %c0_i32_1 = arith.constant 0 : i32
    return %c0_i32, %c0_i32_0 : i32, i32
  }
  func.func @transform_2(%arg0: i32) -> (i32, i32) {
    %c0_i32 = arith.constant 0 : i32
    %c0_i32_0 = arith.constant 0 : i32
    %c0_i32_1 = arith.constant 0 : i32
    return %c0_i32, %c0_i32_0 : i32, i32
  }
  func.func @transform_3(%arg0: i32) -> (i32, i32) {
    %c0_i32 = arith.constant 0 : i32
    %c0_i32_0 = arith.constant 0 : i32
    %c0_i32_1 = arith.constant 0 : i32
    return %c0_i32, %c0_i32_0 : i32, i32
  }
  func.func @transform_4(%arg0: i32) -> (i32, i32) {
    %c0_i32 = arith.constant 0 : i32
    %c0_i32_0 = arith.constant 0 : i32
    %c0_i32_1 = arith.constant 0 : i32
    return %c0_i32, %c0_i32_0 : i32, i32
  }
  func.func @transform_5(%arg0: i32) -> (i32, i32) {
    %c0_i32 = arith.constant 0 : i32
    %c0_i32_0 = arith.constant 0 : i32
    %c0_i32_1 = arith.constant 0 : i32
    return %c0_i32, %c0_i32_0 : i32, i32
  }
  func.func @transform_6(%arg0: i32) -> (i32, i32) {
    %c0_i32 = arith.constant 0 : i32
    %c0_i32_0 = arith.constant 0 : i32
    %c0_i32_1 = arith.constant 0 : i32
    return %c0_i32, %c0_i32_0 : i32, i32
  }
  func.func @transform_7(%arg0: i32) -> (i32, i32) {
    %c0_i32 = arith.constant 0 : i32
    %c0_i32_0 = arith.constant 0 : i32
    return %c0_i32, %arg0 : i32, i32
  }
}

</mosaic_0001>

<bundles_post_ra>
// kernel: tpu_custom_call.1
= control target key start
LH: loop header
LB: loop body
LE: loop exit
PB: predicated region body
PF: predicated region fallthrough
CT: control target
= control target key end

     0   :  { %12 = vsyncpa [#allocation3], 0  ;;  %s3701_s0 = inlined_call_operand.vmem [shape: f32[4,256], index: 0, kind: input, shape index: {}]   ;;  %s3702_s1 = inlined_call_operand.vmem [shape: f32[64,4], index: 1, kind: input, shape index: {}]   ;;  %s3703_s2 = inlined_call_operand.vmem [shape: f32[64,1], index: 2, kind: input, shape index: {}]   ;;  %s3704_s3 = inlined_call_operand.vmem [shape: f32[32,64], index: 3, kind: input, shape index: {}]   ;;  %s3705_s4 = inlined_call_operand.vmem [shape: f32[32,1], index: 4, kind: input, shape index: {}]   ;;  %s3706_s5 = inlined_call_operand.vmem [shape: f32[16,32], index: 5, kind: input, shape index: {}]   ;;  %s3707_s6 = inlined_call_operand.vmem [shape: f32[16,1], index: 6, kind: input, shape index: {}]   ;;  %s3708_s7 = inlined_call_operand.hbm [shape: f32[16,256], index: 7, kind: output, shape index: {}]  }
   0x1   :  { %14 = vsyncpa [#allocation3 + $0x1], 0  ;;  %s3058_s24 = smov 0   ;;  %s3060_s25 = smov 0  }
   0x2   :  { %s3062_s26 = smov 0   ;;  %s3064_s27 = smov 0  }
   0x3 LB: > { %s3079_s28 = sadd.s32 4294967295, %s3011_s27   ;;  %s2452_s29 = sadd.s32 4294967294, %s3011_s27   ;;  %s3011_s27 = sphi %s3064_s27, %s3714_s27   ;;  %s3007_s26 = sphi %s3062_s26, %s3713_s26   ;;  %s3003_s25 = sphi %s3060_s25, %s3712_s25   ;;  %s2999_s24 = sphi %s3058_s24, %s3711_s24  }
   0x4   : > { %s3083_s30 = sadd.s32 1, %s3011_s27   ;;  %s179_s8 = sadd.s32 1, %s3007_s26 }
   0x5   : > { %s176_s9 = ssub.s32 %s3011_s27, %s3083_s30  ;;  %p189_p0 = scmp.ne.s32.totalorder %s3007_s26, %s3003_s25 }
   0x6   : > { %p177_p1 = scmp.eq.s32.totalorder %s176_s9, 0  ;;  %p190_p2 = scmp.eq.s32.totalorder %s3079_s28, 1 }
   0x7   : > { %p195_p3 = scmp.ne.s32.totalorder %s3003_s25, %s2999_s24  ;;  %p196_p4 = scmp.eq.s32.totalorder %s2452_s29, 1 }
   0x8   : > { %s3094_s10 = scalar_select %p177_p1, %s3007_s26, %s179_s8  }
   0x9   : > { %p3096_p5 = por %p190_p2, %p189_p0  ;;  %p3100_p6 = por %p196_p4, %p195_p3 }
   0xa   : > { %p2455_p7 = scmp.ge.s32.totalorder %s3011_s27, 1  ;;  %p239_p8 = scmp.lt.s32.totalorder %s3011_s27, 3 }
   0xc   : > { %p240_p9 = pnand %p2455_p7, %p239_p8 }
   0xd   : > { %p270_p10 = scmp.lt.s32.totalorder (!%p240_p9), %s3079_s28, 1  ;;  %s267_s18 = sand.u32 (!%p240_p9), 1, %s3003_s25  }
   0xe   : > { %243 = sbr.rel (%p240_p9) target bundleno = 796 (0x31c), region = 48  ;;  %s2459_s22 = sshll.u32 (!%p240_p9), %s3079_s28, 7 }
   0xf   : > { %s3661_s9 = scalar_lea.sflag (!%p240_p9), [#allocation3], %s267_s18  ;;  %s3014_s13 = smov (!%p240_p9), [#allocation2]  }
  0x10   : > { %s2955_s14 = sshll.u32 (!%p240_p9), %s3014_s13, 4  ;;  %s2956_s14 = int_to_ptr.vmem [resolvable:$false] %s2955_s14 }
  0x11   : > { %s2957_s15 = scalar_lea.vmem (!%p240_p9), %s2956_s14, 512 }
  0x13   : > { %vm356_vm0 = vcmask 1043456   ;;  %v275_v0 = vld [vmem:[%s3702_s1] sm:$0xff]  ;;  %vm331_vm1 = vcmask 31744   ;;  %v276_v1 = vld [vmem:[%s3702_s1 + $0x8] sm:$0xff]  ;;  %v277_v2 = vld [vmem:[%s3702_s1 + $0x10] sm:$0xff]  ;;  %s271_s8 = scalar_select %p270_p10, %s3079_s28, 1 }
  0x14   : > { %v333_v3 = vsel %vm331_vm1, %v275_v0, 0  ;;  %v336_v4 = vsel %vm331_vm1, %v276_v1, 0  ;;  %v339_v5 = vsel %vm331_vm1, %v277_v2, 0  ;;  %v278_v6 = vld [vmem:[%s3702_s1 + $0x18] sm:$0xff]  ;;  %v279_v7 = vld [vmem:[%s3702_s1 + $0x20] sm:$0xff]  ;;  %v280_v8 = vld [vmem:[%s3702_s1 + $0x28] sm:$0xff] }
  0x15   : > { %v3129_v9 = vand.u32 4294901760, %v333_v3  ;;  %v3131_v10 = vand.u32 4294901760, %v336_v4  ;;  %v3133_v11 = vand.u32 4294901760, %v339_v5  ;;  %v342_v12 = vsel %vm331_vm1, %v278_v6, 0  ;;  %v281_v13 = vld [vmem:[%s3702_s1 + $0x30] sm:$0xff]  ;;  %v282_v18 = vld [vmem:[%s3702_s1 + $0x38] sm:$0xff] }
  0x16   : > { %v3139_v14 = vand.u32 4294901760, %v342_v12  ;;  %v345_v15 = vsel %vm331_vm1, %v279_v7, 0  ;;  %v348_v16 = vsel %vm331_vm1, %v280_v8, 0  ;;  %v351_v17 = vsel %vm331_vm1, %v281_v13, 0  ;;  %s2457_s16 = sshll.u32 %s271_s8, 2  ;;  %v290_v54 = vld [vmem:[%s3703_s2 + $0x38] sm:$0xff]  ;;  %s3659_s8 = scalar_lea.hbm %s3708_s7, %s2459_s22 }
  0x17   : > { %v3148_v19 = vsub.f32 %v333_v3, %v3129_v9  ;;  %v3151_v20 = vsub.f32 %v336_v4, %v3131_v10  ;;  %v3154_v21 = vsub.f32 %v339_v5, %v3133_v11  ;;  %2640 = vmatprep.mubr.f32.mxu1 %v3129_v9  ;;  %v3157_v22 = vand.u32 4294901760, %v345_v15  ;;  %s273_s19 = scalar_lea.vmem %s3701_s0, %s2457_s16  ;;  %v288_v55 = vld [vmem:[%s3703_s2 + $0x28] sm:$0xff]  ;;  %v289_v1 = vld [vmem:[%s3703_s2 + $0x30] sm:$0xff]  ;;  %v287_v3 = vld [vmem:[%s3703_s2 + $0x20] sm:$0xff] }
  0x18   : > { %v3163_v23 = vsub.f32 %v342_v12, %v3139_v14  ;;  %v3165_v24 = vand.u32 4294901760, %v348_v16  ;;  %v3167_v25 = vand.u32 4294901760, %v351_v17  ;;  %v354_v26 = vsel %vm331_vm1, %v282_v18, 0  ;;  %v274_v27 = vld [vmem:[%s273_s19] sm:$0xf]  ;;  %v286_v4 = vld [vmem:[%s3703_s2 + $0x18] sm:$0xff] }
  0x19   : > { %v428_v28 = vand.u32 4294901760, %v3148_v19  ;;  %v438_v29 = vand.u32 4294901760, %v3151_v20  ;;  %v448_v30 = vand.u32 4294901760, %v3154_v21  ;;  %v3174_v31 = vsub.f32 %v345_v15, %v3157_v22  ;;  %v285_v5 = vld [vmem:[%s3703_s2 + $0x10] sm:$0xff]  ;;  %v284_v6 = vld [vmem:[%s3703_s2 + $0x8] sm:$0xff]  ;;  %v283_v7 = vld [vmem:[%s3703_s2] sm:$0xff] }
  0x1a   : > { %v358_v32 = vsel %vm356_vm0, %v274_v27, 0  ;;  %v458_v33 = vand.u32 4294901760, %v3163_v23  ;;  %v3179_v34 = vsub.f32 %v348_v16, %v3165_v24  ;;  %v3182_v35 = vsub.f32 %v351_v17, %v3167_v25  ;;  %v1122_v8 = vld [vmem:[%s3705_s4 + $0x18] sm:$0xff]  ;;  %v1121_v12 = vld [vmem:[%s3705_s4 + $0x10] sm:$0xff]  ;;  %v1120_v13 = vld [vmem:[%s3705_s4 + $0x8] sm:$0xff]  ;;  %s2456_s19 = sshll.u32 %s267_s18, 4 }
  0x1b   : > { %v3184_v36 = vand.u32 4294901760, %v358_v32  ;;  %v429_v37 = vsub.f32 %v3148_v19, %v428_v28  ;;  %v439_v38 = vsub.f32 %v3151_v20, %v438_v29  ;;  %v449_v39 = vsub.f32 %v3154_v21, %v448_v30  ;;  %v1119_v15 = vld [vmem:[%s3705_s4] sm:$0xff]  ;;  %v1829_v17 = vld [vmem:[%s3707_s6 + $0x8] sm:$0xff]  ;;  %s269_s20 = scalar_lea.vmem [#allocation2], %s2456_s19 }
  0x1c   : > { %v459_v40 = vsub.f32 %v3163_v23, %v458_v33  ;;  %v468_v41 = vand.u32 4294901760, %v3174_v31  ;;  %v478_v42 = vand.u32 4294901760, %v3179_v34  ;;  %v488_v43 = vand.u32 4294901760, %v3182_v35  ;;  %v1828_v16 = vld [vmem:[%s3707_s6] sm:$0xff]  ;;  %s2390_s21 = sshll.u32 %s269_s20, 4  ;;  %s3654_s21 = int_to_ptr.vmem [resolvable:$true] %s2390_s21 }
  0x1d   : > { %2624 = vmatprep.subr.mxu0 %v3184_v36  ;;  %v430_v44 = vand.u32 4294901760, %v429_v37  ;;  %v440_v45 = vand.u32 4294901760, %v439_v38  ;;  %v450_v46 = vand.u32 4294901760, %v449_v39  ;;  %v538_v47 = vsub.f32 %v358_v32, %v3184_v36  ;;  %s2951_s28 = scalar_lea.vmem %s3654_s21, 256  ;;  %p2958_p0 = scmp.lt.s32.totalorder %s3654_s21, %s2956_s14 }
  0x1e   : > { %2625 = vmatpush3.msra.mxu0 %v3184_v36  ;;  %v469_v48 = vsub.f32 %v3174_v31, %v468_v41  ;;  %v3207_v50 = vand.u32 4294901760, %v354_v26  ;;  %v460_v51 = vand.u32 4294901760, %v459_v40  ;;  %v479_v52 = vsub.f32 %v3179_v34, %v478_v42  ;;  %p2952_p11 = scmp.ne.s32.totalorder %s3654_s21, %s2951_s28  ;;  %p2959_p1 = scmp.lt.s32.totalorder %s2957_s15, %s2951_s28 }
  0x1f   : > { %2626 = vmatprep.mubr.f32.mxu0 %v430_v44  ;;  %v539_v49 = vand.u32 4294901760, %v538_v47  ;;  %2652 = vmatprep.subr.mxu0 %v538_v47  ;;  %v3013_v53 = vmov 0   ;;  %v489_v58 = vsub.f32 %v3182_v35, %v488_v43  ;;  %vm1143_vm2 = vcmask 523264  }
  0x20   : > { %2627 = vmatmul.mubr.f32.vlgmr.msra.gmra.mxu0 %v440_v45  ;;  %2950 = vset.pattern.permute.xlu1 %v3013_v53  ;;  %v470_v57 = vand.u32 4294901760, %v469_v48  ;;  %v3222_v59 = vsub.f32 %v354_v26, %v3207_v50  ;;  %v480_v62 = vand.u32 4294901760, %v479_v52  ;;  %vm1840_vm3 = vcmask 261120   ;;  %p2953_p12 = pnand %p2952_p11, %p3096_p5  ;;  %p2960_p2 = por %p2959_p1, %p2958_p0 }
  0x21   : > { %2629 = vmatprep.mubr.f32.mxu0 %v450_v46  ;;  %v540_v56 = vsub.f32 %v538_v47, %v539_v49  ;;  %2653 = vmatpush3.msra.mxu0 %v538_v47  ;;  %v490_v63 = vand.u32 4294901760, %v489_v58 }
  0x22   : > { %2680 = vmatprep.subr.mxu0 %v539_v49  ;;  %2949 = vset.pattern.permute.xlu0 %v3013_v53  ;;  %v498_v61 = vand.u32 4294901760, %v3222_v59  ;;  %p2954_p13 = pneg %p2953_p12 }
  0x23   : > { %v541_v60 = vand.u32 4294901760, %v540_v56  ;;  %328 = vperm.xlu0 %2949, %v290_v54   ;;  %318 = vperm.xlu1 %2950, %v288_v55  }
  0x24   : > { %2630 = vmatmul.mubr.f32.gmra.mxu0 %v460_v51  ;;  %v499_v0 = vsub.f32 %v3222_v59, %v498_v61  ;;  %p2961_p3 = pnand %p2960_p2, %p2954_p13 }
  0x25   : > { %2638 = vmatprep.subr.mxu1 %v541_v60  ;;  %2632 = vmatprep.mubr.f32.mxu0 %v470_v57 }
  0x26   : > { %2639 = vmatpush3.msra.mxu1 %v541_v60  ;;  %v500_v2 = vand.u32 4294901760, %v499_v0 }
  0x27   : > { %2641 = vmatmul.mubr.f32.vlgmr.msra.gmra.mxu1 %v3131_v10  ;;  %2666 = vmatprep.subr.mxu1 %v3184_v36 }
  0x28   : > { %2633 = vmatmul.mubr.f32.gmra.mxu0 %v480_v62  ;;  %2667 = vmatpush3.msra.mxu1 %v3184_v36 }
  0x29   : > { %2643 = vmatprep.mubr.f32.mxu1 %v3133_v11  ;;  %2635 = vmatprep.mubr.f32.mxu0 %v490_v63 }
  0x2a   : > { %2694 = vmatprep.subr.mxu1 %v3184_v36  ;;  %323 = vperm.xlu0 %2949, %v289_v1  }
  0x2b   : > { %2644 = vmatmul.mubr.f32.gmra.mxu1 %v3139_v14  ;;  %313 = vperm.xlu1 %2950, %v287_v3  }
  0x2c   : > { %2636 = vmatmul.mubr.f32.gmra.mxu0 %v500_v2  ;;  %2646 = vmatprep.mubr.f32.mxu1 %v3157_v22 }
  0x2d   : > { %2654 = vmatprep.mubr.f32.mxu0 %v3148_v19 }
  0x2e   : > { %308 = vperm.xlu0 %2949, %v286_v4  }
  0x2f   : > { %2647 = vmatmul.mubr.f32.gmra.mxu1 %v3165_v24  ;;  %303 = vperm.xlu1 %2950, %v285_v5  }
  0x30   : > { %2655 = vmatmul.mubr.f32.vlgmr.msra.gmra.mxu0 %v3151_v20  ;;  %2649 = vmatprep.mubr.f32.mxu1 %v3167_v25 }
  0x31   : > { %2657 = vmatprep.mubr.f32.mxu0 %v3154_v21  ;;  %2681 = vmatpush3.msra.mxu0 %v539_v49 }
  0x32   : > { %298 = vperm.xlu0 %2949, %v284_v6  }
  0x33   : > { %2650 = vmatmul.mubr.f32.gmra.mxu1 %v3207_v50  ;;  %293 = vperm.xlu1 %2950, %v283_v7  }
  0x34   : > { %2658 = vmatmul.mubr.f32.gmra.mxu0 %v3163_v23  ;;  %2668 = vmatprep.mubr.f32.mxu1 %v428_v28 }
  0x35   : > { %2660 = vmatprep.mubr.f32.mxu0 %v3174_v31 }
  0x36   : > { %1140 = vperm.xlu0 %2949, %v1122_v8  }
  0x37   : > { %2669 = vmatmul.mubr.f32.vlgmr.msra.gmra.mxu1 %v438_v29  ;;  %1135 = vperm.xlu1 %2950, %v1121_v12  }
  0x38   : > { %2661 = vmatmul.mubr.f32.gmra.mxu0 %v3179_v34  ;;  %2695 = vmatpush3.msra.mxu1 %v3184_v36 }
  0x39   : > { %2671 = vmatprep.mubr.f32.mxu1 %v448_v30  ;;  %2663 = vmatprep.mubr.f32.mxu0 %v3182_v35 }
  0x3a   : > { %1130 = vperm.xlu0 %2949, %v1120_v13  }
  0x3b   : > { %2672 = vmatmul.mubr.f32.gmra.mxu1 %v458_v33  ;;  %1125 = vperm.xlu1 %2950, %v1119_v15  }
  0x3c   : > { %2664 = vmatmul.mubr.f32.gmra.mxu0 %v3222_v59  ;;  %2674 = vmatprep.mubr.f32.mxu1 %v468_v41 }
  0x3d   : > { %2682 = vmatprep.mubr.f32.mxu0 %v3129_v9 }
  0x3e   : > { %1832 = vperm.xlu0 %2949, %v1828_v16  }
  0x3f   : > { %2675 = vmatmul.mubr.f32.gmra.mxu1 %v478_v42  ;;  %1837 = vperm.xlu1 %2950, %v1829_v17  }
  0x40   : > { %2683 = vmatmul.mubr.f32.vlgmr.msra.gmra.mxu0 %v3131_v10  ;;  %2677 = vmatprep.mubr.f32.mxu1 %v488_v43 }
  0x41   : > { %2685 = vmatprep.mubr.f32.mxu0 %v3133_v11 }
  0x43   : > { %2678 = vmatmul.mubr.f32.gmra.mxu1 %v498_v61 }
  0x44   : > { %2686 = vmatmul.mubr.f32.gmra.mxu0 %v3139_v14  ;;  %2696 = vmatprep.mubr.f32.mxu1 %v3129_v9  ;;  %v1115_v9 = vld [vmem:[%s3704_s3] sm:$0xff] }
  0x45   : > { %2688 = vmatprep.mubr.f32.mxu0 %v3157_v22 }
  0x47   : > { %2697 = vmatmul.mubr.f32.vlgmr.msra.gmra.mxu1 %v3131_v10  ;;  %v1145_v10 = vsel %vm1143_vm2, %v1115_v9, 0 }
  0x48   : > { %2689 = vmatmul.mubr.f32.gmra.mxu0 %v3165_v24  ;;  %2699 = vmatprep.mubr.f32.mxu1 %v3133_v11  ;;  %v3319_v11 = vand.u32 4294901760, %v1145_v10 }
  0x49   : > { %2691 = vmatprep.mubr.f32.mxu0 %v3167_v25 }
  0x4b   : > { %2700 = vmatmul.mubr.f32.gmra.mxu1 %v3139_v14  ;;  %v3322_v14 = vsub.f32 %v1145_v10, %v3319_v11 }
  0x4c   : > { %2692 = vmatmul.mubr.f32.gmra.mxu0 %v3207_v50  ;;  %2702 = vmatprep.mubr.f32.mxu1 %v3157_v22 }
  0x4d   : > { %v1231_v18 = vand.u32 4294901760, %v3322_v14 }
  0x4f   : > { %2703 = vmatmul.mubr.f32.gmra.mxu1 %v3165_v24  ;;  %v1232_v19 = vsub.f32 %v3322_v14, %v1231_v18 }
  0x50   : > { %2705 = vmatprep.mubr.f32.mxu1 %v3167_v25 }
  0x51   : > { %v1233_v20 = vand.u32 4294901760, %v1232_v19 }
  0x53   : > { %2706 = vmatmul.mubr.f32.gmra.mxu1 %v3207_v50  ;;  %2724 = vmatprep.mubr.f32.mxu0 %v1233_v20 }
  0x54   : > { %2746 = vmatprep.mubr.f32.mxu1 %v3319_v11 }
  0x9e   : > { %v329_v38 = vpop.permute.xlu0 %328  ;;  %v319_v43 = vpop.permute.xlu1 %318 }
  0xa5   : > { %v324_v46 = vpop.permute.xlu0 %323 }
  0xa6   : > { %v314_v51 = vpop.permute.xlu1 %313 }
  0xa9   : > { %v309_v54 = vpop.permute.xlu0 %308 }
  0xaa   : > { %v304_v60 = vpop.permute.xlu1 %303 }
  0xad   : > { %v299_v0 = vpop.permute.xlu0 %298 }
  0xae   : > { %v294_v16 = vpop.permute.xlu1 %293 }
  0xe0   : > { %v2628_v21 = vpop.f32.mrf.mxu0 }
  0xe1   : > { %v443_v12 = vadd.f32 %v2628_v21, %v299_v0 }
  0xe2   : > { %v3329_v22 = vpop.f32.mrf.mxu0 }
  0xe4   : > { %v2631_v23 = vpop.f32.mrf.mxu0 }
  0xe5   : > { %v463_v58 = vadd.f32 %v2631_v23, %v309_v54 }
  0xe6   : > { %v452_v24 = vpop.f32.mrf.mxu0 }
  0xe7   : > { %v3331_v25 = vpop.f32.mrf.mxu1  ;;  %v453_v4 = vadd.f32 %v452_v24, %v304_v60  ;;  %v433_v24 = vadd.f32 %v3329_v22, %v294_v16 }
  0xe8   : > { %v2634_v26 = vpop.f32.mrf.mxu0 }
  0xe9   : > { %v3333_v27 = vpop.f32.mrf.mxu1  ;;  %v483_v61 = vadd.f32 %v2634_v26, %v319_v43 }
  0xea   : > { %v472_v28 = vpop.f32.mrf.mxu0 }
  0xeb   : > { %v2645_v29 = vpop.f32.mrf.mxu1  ;;  %v473_v5 = vadd.f32 %v472_v28, %v314_v51  ;;  %v585_v28 = vadd.f32 %v3331_v25, %v443_v12 }
  0xec   : > { %v2637_v30 = vpop.f32.mrf.mxu0  ;;  %v597_v2 = vadd.f32 %v2645_v29, %v463_v58 }
  0xed   : > { %v590_v31 = vpop.f32.mrf.mxu1  ;;  %v503_v6 = vadd.f32 %v2637_v30, %v329_v38 }
  0xee   : > { %v492_v32 = vpop.f32.mrf.mxu0  ;;  %v591_v17 = vadd.f32 %v590_v31, %v453_v4 }
  0xef   : > { %v2648_v33 = vpop.f32.mrf.mxu1  ;;  %v493_v20 = vadd.f32 %v492_v32, %v324_v46  ;;  %v1116_v32 = vld [vmem:[%s3704_s3 + $0x8] sm:$0xff] }
  0xf0   : > { %v3335_v34 = vpop.f32.mrf.mxu0  ;;  %v609_v7 = vadd.f32 %v2648_v33, %v483_v61  ;;  %v1148_v61 = vsel %vm1143_vm2, %v1116_v32, 0 }
  0xf1   : > { %v602_v35 = vpop.f32.mrf.mxu1 }
  0xf2   : > { %v3337_v36 = vpop.f32.mrf.mxu0  ;;  %v603_v9 = vadd.f32 %v602_v35, %v473_v5 }
  0xf3   : > { %v2651_v37 = vpop.f32.mrf.mxu1 }
  0xf4   : > { %v2659_v39 = vpop.f32.mrf.mxu0  ;;  %v621_v43 = vadd.f32 %v2651_v37, %v503_v6  ;;  %v579_v37 = vadd.f32 %v3333_v27, %v433_v24  ;;  %v1118_v6 = vld [vmem:[%s3704_s3 + $0x18] sm:$0xff] }
  0xf5   : > { %v614_v40 = vpop.f32.mrf.mxu1  ;;  %v716_v13 = vadd.f32 %v2659_v39, %v597_v2 }
  0xf6   : > { %v708_v41 = vpop.f32.mrf.mxu0  ;;  %v615_v30 = vadd.f32 %v614_v40, %v493_v20 }
  0xf7   : > { %v3339_v42 = vpop.f32.mrf.mxu1  ;;  %v709_v54 = vadd.f32 %v708_v41, %v591_v17  ;;  %v702_v41 = vadd.f32 %v3335_v34, %v585_v28 }
  0xf8   : > { %v2662_v44 = vpop.f32.mrf.mxu0 }
  0xf9   : > { %v3341_v45 = vpop.f32.mrf.mxu1  ;;  %v730_v10 = vadd.f32 %v2662_v44, %v609_v7 }
  0xfa   : > { %v722_v47 = vpop.f32.mrf.mxu0 }
  0xfb   : > { %v2673_v48 = vpop.f32.mrf.mxu1  ;;  %v723_v29 = vadd.f32 %v722_v47, %v603_v9 }
  0xfc   : > { %v2665_v49 = vpop.f32.mrf.mxu0  ;;  %v842_v23 = vadd.f32 %v2673_v48, %v716_v13  ;;  %v3368_v13 = vand.u32 4294901760, %v1148_v61 }
  0xfd   : > { %v833_v50 = vpop.f32.mrf.mxu1  ;;  %v744_v39 = vadd.f32 %v2665_v49, %v621_v43  ;;  %v695_v49 = vadd.f32 %v3337_v36, %v579_v37 }
  0xfe   : > { %v736_v52 = vpop.f32.mrf.mxu0  ;;  %v834_v31 = vadd.f32 %v833_v50, %v709_v54  ;;  %v826_v50 = vadd.f32 %v3339_v42, %v702_v41  ;;  %v3382_v43 = vsub.f32 %v1148_v61, %v3368_v13 }
  0xff   : > { %v2676_v53 = vpop.f32.mrf.mxu1  ;;  %v737_v46 = vadd.f32 %v736_v52, %v615_v30  ;;  %v1117_v52 = vld [vmem:[%s3704_s3 + $0x10] sm:$0xff] }
 0x100   : > { %v3343_v55 = vpop.f32.mrf.mxu0  ;;  %v858_v58 = vadd.f32 %v2676_v53, %v730_v10 }
 0x101   : > { %v849_v56 = vpop.f32.mrf.mxu1 }
 0x102   : > { %v3345_v57 = vpop.f32.mrf.mxu0  ;;  %v850_v35 = vadd.f32 %v849_v56, %v723_v29 }
 0x103   : > { %v2679_v59 = vpop.f32.mrf.mxu1 }
 0x104   : > { %v2687_v62 = vpop.f32.mrf.mxu0  ;;  %v874_v25 = vadd.f32 %v2679_v59, %v744_v39  ;;  %v818_v59 = vadd.f32 %v3341_v45, %v695_v49  ;;  %v1151_v45 = vsel %vm1143_vm2, %v1117_v52, 0 }
 0x105   : > { %v865_v63 = vpop.f32.mrf.mxu1  ;;  %v966_v21 = vadd.f32 %v2687_v62, %v842_v23  ;;  %v3384_v54 = vand.u32 4294901760, %v1151_v45 }
 0x106   : > { %v959_v1 = vpop.f32.mrf.mxu0  ;;  %v866_v53 = vadd.f32 %v865_v63, %v737_v46  ;;  %v948_v7 = vadd.f32 %v3345_v57, %v818_v59 }
 0x107   : > { %v2698_v3 = vpop.f32.mrf.mxu1  ;;  %v960_v40 = vadd.f32 %v959_v1, %v834_v31  ;;  %v954_v1 = vadd.f32 %v3343_v55, %v826_v50 }
 0x108   : > { %v2690_v8 = vpop.f32.mrf.mxu0 }
 0x109   : > { %v1061_v15 = vpop.f32.mrf.mxu1  ;;  %v978_v44 = vadd.f32 %v2690_v8, %v858_v58  ;;  %v1068_v8 = vadd.f32 %v2698_v3, %v954_v1 }
 0x10a   : > { %v971_v19 = vpop.f32.mrf.mxu0  ;;  %v1062_v10 = vadd.f32 %v1061_v15, %v948_v7 }
 0x10b   : > { %v2701_v26 = vpop.f32.mrf.mxu1  ;;  %v972_v48 = vadd.f32 %v971_v19, %v850_v35  ;;  %v1154_v19 = vsel %vm1143_vm2, %v1118_v6, 0  ;;  %v1241_v35 = vand.u32 4294901760, %v3382_v43 }
 0x10c   : > { %v2693_v33 = vpop.f32.mrf.mxu0  ;;  %v1080_v22 = vadd.f32 %v2701_v26, %v966_v21  ;;  %v1108_v26 = vmax.f32 %v1068_v8, 0.0  ;;  %v1107_v28 = vmax.f32 %v1062_v10, 0.0  ;;  %v3398_v30 = vand.u32 4294901760, %v1154_v19 }
 0x10d   : > { %v1073_v38 = vpop.f32.mrf.mxu1  ;;  %v990_v62 = vadd.f32 %v2693_v33, %v874_v25 }
 0x10e   : > { %v983_v56 = vpop.f32.mrf.mxu0  ;;  %v1074_v27 = vadd.f32 %v1073_v38, %v960_v40  ;;  %v1110_v36 = vmax.f32 %v1080_v22, 0.0  ;;  %v3413_v31 = vand.u32 4294901760, %v1108_v26  ;;  %v3432_v22 = vand.u32 4294901760, %v1107_v28 }
 0x10f   : > { %v2704_v47 = vpop.f32.mrf.mxu1  ;;  %v984_v42 = vadd.f32 %v983_v56, %v866_v53 }
 0x110   : > { %v1092_v51 = vadd.f32 %v2704_v47, %v978_v44  ;;  %v1109_v55 = vmax.f32 %v1074_v27, 0.0  ;;  %v3374_v20 = vand.u32 4294901760, %v1110_v36  ;;  %v3418_v44 = vsub.f32 %v1151_v45, %v3384_v54 }
 0x111   : > { %v1085_v60 = vpop.f32.mrf.mxu1  ;;  %v3436_v47 = vsub.f32 %v1154_v19, %v3398_v30  ;;  %v3447_v49 = vsub.f32 %v1108_v26, %v3413_v31 }
 0x112   : > { %v1112_v0 = vmax.f32 %v1092_v51, 0.0  ;;  %v1086_v34 = vadd.f32 %v1085_v60, %v972_v48  ;;  %v3386_v29 = vand.u32 4294901760, %v1109_v55  ;;  %v3401_v21 = vsub.f32 %v1110_v36, %v3374_v20 }
 0x113   : > { %v2707_v2 = vpop.f32.mrf.mxu1  ;;  %v1251_v50 = vand.u32 4294901760, %v3418_v44  ;;  %v1242_v60 = vsub.f32 %v3382_v43, %v1241_v35  ;;  %v1261_v27 = vand.u32 4294901760, %v3436_v47  ;;  %v3473_v59 = vand.u32 4294901760, %v3447_v49 }
 0x114   : > { %v3362_v63 = vand.u32 4294901760, %v1112_v0  ;;  %v1111_v4 = vmax.f32 %v1086_v34, 0.0  ;;  %v1104_v5 = vadd.f32 %v2707_v2, %v990_v62  ;;  %v3421_v32 = vsub.f32 %v1109_v55, %v3386_v29 }
 0x115   : > { %v1097_v12 = vpop.f32.mrf.mxu1  ;;  %v3444_v51 = vand.u32 4294901760, %v3401_v21  ;;  %v3461_v62 = vsub.f32 %v1107_v28, %v3432_v22  ;;  %v1252_v52 = vsub.f32 %v3418_v44, %v1251_v50  ;;  %v1243_v36 = vand.u32 4294901760, %v1242_v60 }
 0x116   : > { %v3371_v16 = vand.u32 4294901760, %v1111_v4  ;;  %v1114_v17 = vmax.f32 %v1104_v5, 0.0  ;;  %v1098_v9 = vadd.f32 %v1097_v12, %v984_v42  ;;  %v3377_v23 = vsub.f32 %v1112_v0, %v3362_v63 }
 0x117   : > { %v3458_v61 = vand.u32 4294901760, %v3421_v32  ;;  %v1317_v34 = vsub.f32 %v3401_v21, %v3444_v51  ;;  %v1262_v42 = vsub.f32 %v3436_v47, %v1261_v27  ;;  %v1253_v6 = vand.u32 4294901760, %v1252_v52 }
 0x118   : > { %v3379_v57 = vand.u32 4294901760, %v1114_v17  ;;  %v1113_v3 = vmax.f32 %v1098_v9, 0.0  ;;  %v3389_v15 = vsub.f32 %v1111_v4, %v3371_v16  ;;  %v3411_v39 = vand.u32 4294901760, %v3377_v23 }
 0x119   : > { %v1324_v2 = vsub.f32 %v3421_v32, %v3458_v61  ;;  %v3483_v4 = vand.u32 4294901760, %v3461_v62  ;;  %v1318_v5 = vand.u32 4294901760, %v1317_v34  ;;  %v1331_v7 = vsub.f32 %v3447_v49, %v3473_v59 }
 0x11a   : > { %v3392_v58 = vsub.f32 %v1114_v17, %v3379_v57  ;;  %v3394_v24 = vand.u32 4294901760, %v1113_v3  ;;  %2708 = vmatprep.subr.mxu0 %v3379_v57  ;;  %v3430_v46 = vand.u32 4294901760, %v3389_v15  ;;  %v1303_v48 = vsub.f32 %v3377_v23, %v3411_v39 }
 0x11b   : > { %2709 = vmatpush3.msra.mxu0 %v3379_v57  ;;  %v1325_v8 = vand.u32 4294901760, %v1324_v2  ;;  %v1263_v12 = vand.u32 4294901760, %v1262_v42  ;;  %v1338_v45 = vsub.f32 %v3461_v62, %v3483_v4  ;;  %v1332_v55 = vand.u32 4294901760, %v1331_v7 }
 0x11c   : > { %v3404_v33 = vsub.f32 %v1113_v3, %v3394_v24  ;;  %2710 = vmatprep.subr.mxu0 %v3394_v24  ;;  %v3408_v38 = vand.u32 4294901760, %v3392_v58  ;;  %v1310_v56 = vsub.f32 %v3389_v15, %v3430_v46  ;;  %v1304_v0 = vand.u32 4294901760, %v1303_v48 }
 0x11d   : > { %2711 = vmatpush3.msra.mxu0 %v3394_v24  ;;  %v1339_v17 = vand.u32 4294901760, %v1338_v45 }
 0x11e   : > { %2712 = vmatprep.subr.mxu0 %v3362_v63  ;;  %v1289_v37 = vsub.f32 %v3392_v58, %v3408_v38  ;;  %v3427_v41 = vand.u32 4294901760, %v3404_v33  ;;  %v1311_v1 = vand.u32 4294901760, %v1310_v56 }
 0x11f   : > { %2713 = vmatpush3.msra.mxu0 %v3362_v63 }
 0x120   : > { %2714 = vmatprep.subr.mxu0 %v3371_v16  ;;  %v1290_v25 = vand.u32 4294901760, %v1289_v37  ;;  %v1296_v40 = vsub.f32 %v3404_v33, %v3427_v41 }
 0x121   : > { %2715 = vmatpush3.msra.mxu0 %v3371_v16 }
 0x122   : > { %2716 = vmatprep.subr.mxu0 %v3374_v20  ;;  %2730 = vmatprep.subr.mxu1 %v1290_v25  ;;  %v1297_v53 = vand.u32 4294901760, %v1296_v40 }
 0x123   : > { %2717 = vmatpush3.msra.mxu0 %v3374_v20  ;;  %2731 = vmatpush3.msra.mxu1 %v1290_v25 }
 0x124   : > { %2718 = vmatprep.subr.mxu0 %v3386_v29  ;;  %2732 = vmatprep.subr.mxu1 %v1297_v53 }
 0x125   : > { %2719 = vmatpush3.msra.mxu0 %v3386_v29  ;;  %2733 = vmatpush3.msra.mxu1 %v1297_v53 }
 0x126   : > { %2720 = vmatprep.subr.mxu0 %v3413_v31  ;;  %2734 = vmatprep.subr.mxu1 %v1304_v0 }
 0x127   : > { %2721 = vmatpush3.msra.mxu0 %v3413_v31  ;;  %2735 = vmatpush3.msra.mxu1 %v1304_v0 }
 0x128   : > { %2722 = vmatprep.subr.mxu0 %v3432_v22  ;;  %2736 = vmatprep.subr.mxu1 %v1311_v1 }
 0x129   : > { %2723 = vmatpush3.msra.mxu0 %v3432_v22  ;;  %2737 = vmatpush3.msra.mxu1 %v1311_v1 }
 0x12a   : > { %2725 = vmatmul.mubr.f32.vlgmr.msra.gmra.mxu0 %v1243_v36  ;;  %2738 = vmatprep.subr.mxu1 %v1318_v5 }
 0x12b   : > { %2752 = vmatprep.subr.mxu0 %v3392_v58  ;;  %2739 = vmatpush3.msra.mxu1 %v1318_v5 }
 0x12c   : > { %2753 = vmatpush3.msra.mxu0 %v3392_v58  ;;  %2740 = vmatprep.subr.mxu1 %v1325_v8 }
 0x12d   : > { %2754 = vmatprep.subr.mxu0 %v3404_v33  ;;  %2727 = vmatprep.mubr.f32.mxu0 %v1253_v6 }
 0x12e   : > { %2741 = vmatpush3.msra.mxu1 %v1325_v8  ;;  %2755 = vmatpush3.msra.mxu0 %v3404_v33 }
 0x12f   : > { %2728 = vmatmul.mubr.f32.gmra.mxu0 %v1263_v12  ;;  %2742 = vmatprep.subr.mxu1 %v1332_v55 }
 0x130   : > { %2756 = vmatprep.subr.mxu0 %v3377_v23  ;;  %2743 = vmatpush3.msra.mxu1 %v1332_v55 }
 0x131   : > { %2757 = vmatpush3.msra.mxu0 %v3377_v23  ;;  %2744 = vmatprep.subr.mxu1 %v1339_v17 }
 0x132   : > { %2758 = vmatprep.subr.mxu0 %v3389_v15  ;;  %2745 = vmatpush3.msra.mxu1 %v1339_v17 }
 0x133   : > { %2759 = vmatpush3.msra.mxu0 %v3389_v15  ;;  %2747 = vmatmul.mubr.f32.vlgmr.msra.gmra.mxu1 %v3368_v13 }
 0x134   : > { %2760 = vmatprep.subr.mxu0 %v3401_v21  ;;  %2774 = vmatprep.subr.mxu1 %v3379_v57 }
 0x135   : > { %2761 = vmatpush3.msra.mxu0 %v3401_v21  ;;  %2775 = vmatpush3.msra.mxu1 %v3379_v57 }
 0x136   : > { %2762 = vmatprep.subr.mxu0 %v3421_v32  ;;  %2776 = vmatprep.subr.mxu1 %v3394_v24 }
 0x137   : > { %2749 = vmatprep.mubr.f32.mxu1 %v3384_v54  ;;  %2763 = vmatpush3.msra.mxu0 %v3421_v32 }
 0x138   : > { %2777 = vmatpush3.msra.mxu1 %v3394_v24  ;;  %2764 = vmatprep.subr.mxu0 %v3447_v49 }
 0x139   : > { %2750 = vmatmul.mubr.f32.gmra.mxu1 %v3398_v30  ;;  %2778 = vmatprep.subr.mxu1 %v3362_v63 }
 0x13a   : > { %2765 = vmatpush3.msra.mxu0 %v3447_v49  ;;  %2779 = vmatpush3.msra.mxu1 %v3362_v63 }
 0x13b   : > { %2766 = vmatprep.subr.mxu0 %v3461_v62  ;;  %2780 = vmatprep.subr.mxu1 %v3371_v16 }
 0x13c   : > { %2767 = vmatpush3.msra.mxu0 %v3461_v62  ;;  %2768 = vmatprep.mubr.f32.mxu0 %v3322_v14 }
 0x13d   : > { %2781 = vmatpush3.msra.mxu1 %v3371_v16  ;;  %2769 = vmatmul.mubr.f32.vlgmr.msra.gmra.mxu0 %v3382_v43 }
 0x13e   : > { %2782 = vmatprep.subr.mxu1 %v3374_v20  ;;  %2796 = vmatprep.subr.mxu0 %v3408_v38 }
 0x13f   : > { %2783 = vmatpush3.msra.mxu1 %v3374_v20  ;;  %2797 = vmatpush3.msra.mxu0 %v3408_v38 }
 0x140   : > { %2784 = vmatprep.subr.mxu1 %v3386_v29  ;;  %2798 = vmatprep.subr.mxu0 %v3427_v41 }
 0x141   : > { %2771 = vmatprep.mubr.f32.mxu0 %v3418_v44  ;;  %2785 = vmatpush3.msra.mxu1 %v3386_v29 }
 0x142   : > { %2799 = vmatpush3.msra.mxu0 %v3427_v41  ;;  %2786 = vmatprep.subr.mxu1 %v3413_v31 }
 0x143   : > { %2772 = vmatmul.mubr.f32.gmra.mxu0 %v3436_v47  ;;  %2800 = vmatprep.subr.mxu0 %v3411_v39 }
 0x144   : > { %2787 = vmatpush3.msra.mxu1 %v3413_v31  ;;  %2801 = vmatpush3.msra.mxu0 %v3411_v39 }
 0x145   : > { %2788 = vmatprep.subr.mxu1 %v3432_v22  ;;  %2802 = vmatprep.subr.mxu0 %v3430_v46 }
 0x146   : > { %2789 = vmatpush3.msra.mxu1 %v3432_v22  ;;  %2790 = vmatprep.mubr.f32.mxu1 %v1231_v18 }
 0x147   : > { %2803 = vmatpush3.msra.mxu0 %v3430_v46  ;;  %2791 = vmatmul.mubr.f32.vlgmr.msra.gmra.mxu1 %v1241_v35  ;;  %v1827_v35 = vld [vmem:[%s3706_s5 + $0x8] sm:$0xff] }
 0x148   : > { %2804 = vmatprep.subr.mxu0 %v3444_v51  ;;  %2818 = vmatprep.subr.mxu1 %v3379_v57  ;;  %v1845_v25 = vsel %vm1840_vm3, %v1827_v35, 0 }
 0x149   : > { %2805 = vmatpush3.msra.mxu0 %v3444_v51  ;;  %2819 = vmatpush3.msra.mxu1 %v3379_v57  ;;  %v3596_v56 = vand.u32 4294901760, %v1845_v25 }
 0x14a   : > { %2806 = vmatprep.subr.mxu0 %v3458_v61  ;;  %2820 = vmatprep.subr.mxu1 %v3394_v24 }
 0x14b   : > { %2793 = vmatprep.mubr.f32.mxu1 %v1251_v50  ;;  %2807 = vmatpush3.msra.mxu0 %v3458_v61  ;;  %v3599_v42 = vsub.f32 %v1845_v25, %v3596_v56 }
 0x14c   : > { %2821 = vmatpush3.msra.mxu1 %v3394_v24  ;;  %2808 = vmatprep.subr.mxu0 %v3473_v59  ;;  %v1136_v24 = vpop.permute.xlu1 %1135 }
 0x14d   : > { %2794 = vmatmul.mubr.f32.gmra.mxu1 %v1261_v27  ;;  %2822 = vmatprep.subr.mxu1 %v3362_v63 }
 0x14e   : > { %2809 = vmatpush3.msra.mxu0 %v3473_v59  ;;  %2823 = vmatpush3.msra.mxu1 %v3362_v63 }
 0x14f   : > { %2810 = vmatprep.subr.mxu0 %v3483_v4  ;;  %2824 = vmatprep.subr.mxu1 %v3371_v16 }
 0x150   : > { %2811 = vmatpush3.msra.mxu0 %v3483_v4  ;;  %2812 = vmatprep.mubr.f32.mxu0 %v3319_v11 }
 0x151   : > { %2825 = vmatpush3.msra.mxu1 %v3371_v16  ;;  %2813 = vmatmul.mubr.f32.vlgmr.msra.gmra.mxu0 %v3368_v13 }
 0x152   : > { %2826 = vmatprep.subr.mxu1 %v3374_v20  ;;  %2815 = vmatprep.mubr.f32.mxu0 %v3384_v54 }
 0x153   : > { %2827 = vmatpush3.msra.mxu1 %v3374_v20  ;;  %2834 = vmatprep.mubr.f32.mxu1 %v3319_v11  ;;  %v1826_v11 = vld [vmem:[%s3706_s5] sm:$0xff] }
 0x154   : > { %2828 = vmatprep.subr.mxu1 %v3386_v29  ;;  %v1842_v14 = vsel %vm1840_vm3, %v1826_v11, 0 }
 0x155   : > { %2829 = vmatpush3.msra.mxu1 %v3386_v29  ;;  %2816 = vmatmul.mubr.f32.gmra.mxu0 %v3398_v30  ;;  %v3582_v18 = vand.u32 4294901760, %v1842_v14  ;;  %v1141_v29 = vpop.permute.xlu0 %1140 }
 0x156   : > { %2830 = vmatprep.subr.mxu1 %v3413_v31 }
 0x157   : > { %2831 = vmatpush3.msra.mxu1 %v3413_v31  ;;  %v3585_v63 = vsub.f32 %v1842_v14, %v3582_v18  ;;  %v1126_v31 = vpop.permute.xlu1 %1125 }
 0x158   : > { %2832 = vmatprep.subr.mxu1 %v3432_v22 }
 0x159   : > { %2833 = vmatpush3.msra.mxu1 %v3432_v22  ;;  %v1131_v21 = vpop.permute.xlu0 %1130 }
 0x15a   : > { %2835 = vmatmul.mubr.f32.vlgmr.msra.gmra.mxu1 %v3368_v13  ;;  %v1918_v13 = vand.u32 4294901760, %v3585_v63 }
 0x15b   : > { %2837 = vmatprep.mubr.f32.mxu1 %v3384_v54 }
 0x15c   : > { %v1919_v16 = vsub.f32 %v3585_v63, %v1918_v13 }
 0x15e   : > { %2838 = vmatmul.mubr.f32.gmra.mxu1 %v3398_v30  ;;  %v1920_v9 = vand.u32 4294901760, %v1919_v16 }
 0x15f   : > { %2859 = vmatprep.mubr.f32.mxu1 %v3582_v18 }
 0x160   : > { %2848 = vmatprep.mubr.f32.mxu0 %v1920_v9 }
 0x1ea   : > { %v2726_v10 = vpop.f32.mrf.mxu0 }
 0x1eb   : > { %v1246_v38 = vadd.f32 %v2726_v10, %v1131_v21  ;;  %v1928_v10 = vand.u32 4294901760, %v3599_v42 }
 0x1ec   : > { %v1235_v19 = vpop.f32.mrf.mxu0 }
 0x1ed   : > { %v1236_v44 = vadd.f32 %v1235_v19, %v1126_v31 }
 0x1ef   : > { %v2729_v20 = vpop.f32.mrf.mxu0 }
 0x1f0   : > { %v1266_v46 = vadd.f32 %v2729_v20, %v1141_v29 }
 0x1f1   : > { %v1255_v57 = vpop.f32.mrf.mxu0 }
 0x1f2   : > { %v1256_v40 = vadd.f32 %v1255_v57, %v1136_v24 }
 0x1f3   : > { %v2748_v23 = vpop.f32.mrf.mxu1 }
 0x1f4   : > { %v1383_v32 = vadd.f32 %v2748_v23, %v1246_v38 }
 0x1f5   : > { %v1376_v3 = vpop.f32.mrf.mxu1 }
 0x1f6   : > { %v1377_v22 = vadd.f32 %v1376_v3, %v1236_v44 }
 0x1f9   : > { %v2751_v43 = vpop.f32.mrf.mxu1 }
 0x1fa   : > { %v1395_v48 = vadd.f32 %v2751_v43, %v1266_v46  ;;  %v1929_v43 = vsub.f32 %v3599_v42, %v1928_v10 }
 0x1fb   : > { %v1388_v15 = vpop.f32.mrf.mxu1 }
 0x1fc   : > { %v1389_v60 = vadd.f32 %v1388_v15, %v1256_v40 }
 0x1fd   : > { %v2770_v26 = vpop.f32.mrf.mxu0 }
 0x1fe   : > { %v1490_v47 = vadd.f32 %v2770_v26, %v1383_v32  ;;  %v1838_v32 = vpop.permute.xlu1 %1837 }
 0x1ff   : > { %v1482_v54 = vpop.f32.mrf.mxu0 }
 0x200   : > { %v1483_v51 = vadd.f32 %v1482_v54, %v1377_v22 }
 0x203   : > { %v2773_v58 = vpop.f32.mrf.mxu0 }
 0x204   : > { %v1504_v61 = vadd.f32 %v2773_v58, %v1395_v48  ;;  %v1930_v58 = vand.u32 4294901760, %v1929_v43 }
 0x205   : > { %v1496_v30 = vpop.f32.mrf.mxu0 }
 0x206   : > { %v1497_v34 = vadd.f32 %v1496_v30, %v1389_v60 }
 0x207   : > { %v2792_v28 = vpop.f32.mrf.mxu1 }
 0x208   : > { %v1593_v49 = vadd.f32 %v2792_v28, %v1490_v47 }
 0x209   : > { %v1584_v33 = vpop.f32.mrf.mxu1 }
 0x20a   : > { %v1585_v62 = vadd.f32 %v1584_v33, %v1483_v51 }
 0x20d   : > { %v2795_v37 = vpop.f32.mrf.mxu1 }
 0x20e   : > { %v1609_v52 = vadd.f32 %v2795_v37, %v1504_v61 }
 0x20f   : > { %v1600_v50 = vpop.f32.mrf.mxu1 }
 0x210   : > { %v1601_v4 = vadd.f32 %v1600_v50, %v1497_v34 }
 0x211   : > { %v2814_v39 = vpop.f32.mrf.mxu0 }
 0x212   : > { %v1710_v27 = vadd.f32 %v2814_v39, %v1593_v49 }
 0x213   : > { %v1703_v41 = vpop.f32.mrf.mxu0 }
 0x214   : > { %v1704_v59 = vadd.f32 %v1703_v41, %v1585_v62  ;;  %v1833_v41 = vpop.permute.xlu0 %1832 }
 0x215   : > { %v2817_v53 = vpop.f32.mrf.mxu0 }
 0x216   : > { %v1722_v5 = vadd.f32 %v2817_v53, %v1609_v52 }
 0x217   : > { %v1715_v36 = vpop.f32.mrf.mxu0 }
 0x218   : > { %v1716_v12 = vadd.f32 %v1715_v36, %v1601_v4 }
 0x21a   : > { %v2836_v0 = vpop.f32.mrf.mxu1 }
 0x21b   : > { %v1807_v1 = vadd.f32 %v2836_v0, %v1710_v27 }
 0x21c   : > { %v1800_v2 = vpop.f32.mrf.mxu1 }
 0x21d   : > { %v1823_v6 = vmax.f32 %v1807_v1, 0.0  ;;  %v1801_v7 = vadd.f32 %v1800_v2, %v1704_v59 }
 0x21e   : > { %v2839_v8 = vpop.f32.mrf.mxu1 }
 0x21f   : > { %v3601_v45 = vand.u32 4294901760, %v1823_v6  ;;  %v1822_v55 = vmax.f32 %v1801_v7, 0.0  ;;  %v1819_v17 = vadd.f32 %v2839_v8, %v1722_v5 }
 0x220   : > { %v1812_v11 = vpop.f32.mrf.mxu1 }
 0x221   : > { %v3603_v14 = vand.u32 4294901760, %v1822_v55  ;;  %v1825_v16 = vmax.f32 %v1819_v17, 0.0  ;;  %v1813_v9 = vadd.f32 %v1812_v11, %v1716_v12  ;;  %v1976_v19 = vsub.f32 %v1823_v6, %v3601_v45 }
 0x223   : > { %v3607_v20 = vand.u32 4294901760, %v1825_v16  ;;  %v1824_v23 = vmax.f32 %v1813_v9, 0.0  ;;  %v1983_v57 = vsub.f32 %v1822_v55, %v3603_v14  ;;  %v1977_v15 = vand.u32 4294901760, %v1976_v19 }
 0x225   : > { %v1962_v3 = vsub.f32 %v1825_v16, %v3607_v20  ;;  %v3611_v26 = vand.u32 4294901760, %v1824_v23  ;;  %2840 = vmatprep.subr.mxu0 %v3607_v20  ;;  %v1984_v30 = vand.u32 4294901760, %v1983_v57  ;;  %v1978_v38 = vsub.f32 %v1976_v19, %v1977_v15 }
 0x226   : > { %2841 = vmatpush3.msra.mxu0 %v3607_v20 }
 0x227   : > { %v1969_v54 = vsub.f32 %v1824_v23, %v3611_v26  ;;  %2842 = vmatprep.subr.mxu0 %v3611_v26  ;;  %v1963_v29 = vand.u32 4294901760, %v1962_v3  ;;  %v1985_v31 = vsub.f32 %v1983_v57, %v1984_v30  ;;  %v1979_v35 = vand.u32 4294901760, %v1978_v38 }
 0x228   : > { %2843 = vmatpush3.msra.mxu0 %v3611_v26 }
 0x229   : > { %2844 = vmatprep.subr.mxu0 %v3601_v45  ;;  %v1964_v24 = vsub.f32 %v1962_v3, %v1963_v29  ;;  %v1970_v28 = vand.u32 4294901760, %v1969_v54  ;;  %v1986_v44 = vand.u32 4294901760, %v1985_v31 }
 0x22a   : > { %2845 = vmatpush3.msra.mxu0 %v3601_v45 }
 0x22b   : > { %2846 = vmatprep.subr.mxu0 %v3603_v14  ;;  %v1965_v21 = vand.u32 4294901760, %v1964_v24  ;;  %v1971_v33 = vsub.f32 %v1969_v54, %v1970_v28 }
 0x22c   : > { %2847 = vmatpush3.msra.mxu0 %v3603_v14 }
 0x22d   : > { %2849 = vmatmul.mubr.f32.vlgmr.msra.gmra.mxu0 %v1930_v58  ;;  %2851 = vmatprep.subr.mxu1 %v1965_v21  ;;  %v1972_v39 = vand.u32 4294901760, %v1971_v33 }
 0x22e   : > { %2862 = vmatprep.subr.mxu0 %v1962_v3  ;;  %2852 = vmatpush3.msra.mxu1 %v1965_v21 }
 0x22f   : > { %2863 = vmatpush3.msra.mxu0 %v1962_v3  ;;  %2853 = vmatprep.subr.mxu1 %v1972_v39 }
 0x230   : > { %2864 = vmatprep.subr.mxu0 %v1969_v54  ;;  %2854 = vmatpush3.msra.mxu1 %v1972_v39 }
 0x231   : > { %2865 = vmatpush3.msra.mxu0 %v1969_v54  ;;  %2855 = vmatprep.subr.mxu1 %v1979_v35 }
 0x232   : > { %2866 = vmatprep.subr.mxu0 %v1976_v19  ;;  %2856 = vmatpush3.msra.mxu1 %v1979_v35 }
 0x233   : > { %2867 = vmatpush3.msra.mxu0 %v1976_v19  ;;  %2857 = vmatprep.subr.mxu1 %v1986_v44 }
 0x234   : > { %2868 = vmatprep.subr.mxu0 %v1983_v57  ;;  %2858 = vmatpush3.msra.mxu1 %v1986_v44 }
 0x235   : > { %2869 = vmatpush3.msra.mxu0 %v1983_v57  ;;  %2860 = vmatmul.mubr.f32.vlgmr.msra.gmra.mxu1 %v3596_v56 }
 0x236   : > { %2870 = vmatprep.mubr.f32.mxu0 %v3585_v63  ;;  %2873 = vmatprep.subr.mxu1 %v3607_v20 }
 0x237   : > { %2884 = vmatprep.subr.mxu0 %v1963_v29  ;;  %2871 = vmatmul.mubr.f32.vlgmr.msra.gmra.mxu0 %v3599_v42 }
 0x238   : > { %2874 = vmatpush3.msra.mxu1 %v3607_v20  ;;  %2885 = vmatpush3.msra.mxu0 %v1963_v29 }
 0x239   : > { %2875 = vmatprep.subr.mxu1 %v3611_v26  ;;  %2886 = vmatprep.subr.mxu0 %v1970_v28 }
 0x23a   : > { %2876 = vmatpush3.msra.mxu1 %v3611_v26  ;;  %2887 = vmatpush3.msra.mxu0 %v1970_v28 }
 0x23b   : > { %2877 = vmatprep.subr.mxu1 %v3601_v45  ;;  %2888 = vmatprep.subr.mxu0 %v1977_v15 }
 0x23c   : > { %2878 = vmatpush3.msra.mxu1 %v3601_v45  ;;  %2889 = vmatpush3.msra.mxu0 %v1977_v15 }
 0x23d   : > { %2879 = vmatprep.subr.mxu1 %v3603_v14  ;;  %2890 = vmatprep.subr.mxu0 %v1984_v30 }
 0x23e   : > { %2880 = vmatpush3.msra.mxu1 %v3603_v14  ;;  %2881 = vmatprep.mubr.f32.mxu1 %v1918_v13 }
 0x23f   : > { %2891 = vmatpush3.msra.mxu0 %v1984_v30  ;;  %2882 = vmatmul.mubr.f32.vlgmr.msra.gmra.mxu1 %v1928_v10 }
 0x240   : > { %2895 = vmatprep.subr.mxu1 %v3607_v20  ;;  %2892 = vmatprep.mubr.f32.mxu0 %v3582_v18 }
 0x241   : > { %2896 = vmatpush3.msra.mxu1 %v3607_v20  ;;  %2893 = vmatmul.mubr.f32.vlgmr.msra.gmra.mxu0 %v3596_v56 }
 0x242   : > { %2897 = vmatprep.subr.mxu1 %v3611_v26  ;;  %2903 = vmatprep.mubr.f32.mxu1 %v3582_v18 }
 0x243   : > { %2898 = vmatpush3.msra.mxu1 %v3611_v26 }
 0x244   : > { %2899 = vmatprep.subr.mxu1 %v3601_v45 }
 0x245   : > { %2900 = vmatpush3.msra.mxu1 %v3601_v45 }
 0x246   : > { %2901 = vmatprep.subr.mxu1 %v3603_v14 }
 0x247   : > { %2902 = vmatpush3.msra.mxu1 %v3603_v14 }
 0x248   : > { %2904 = vmatmul.mubr.f32.vlgmr.msra.gmra.mxu1 %v3596_v56 }
 0x2ed   : > { %v2850_v63 = vpop.f32.mrf.mxu0 }
 0x2ee   : > { %v1933_v46 = vadd.f32 %v2850_v63, %v1838_v32 }
 0x2ef   : > { %v1922_v37 = vpop.f32.mrf.mxu0 }
 0x2f0   : > { %v1923_v47 = vadd.f32 %v1922_v37, %v1833_v41 }
 0x2f5   : > { %v2861_v13 = vpop.f32.mrf.mxu1 }
 0x2f6   : > { %v2030_v25 = vadd.f32 %v2861_v13, %v1933_v46 }
 0x2f7   : > { %v2023_v18 = vpop.f32.mrf.mxu1  ;;  %v2872_v22 = vpop.f32.mrf.mxu0 }
 0x2f8   : > { %v2024_v40 = vadd.f32 %v2023_v18, %v1923_v47  ;;  %v2117_v49 = vadd.f32 %v2872_v22, %v2030_v25 }
 0x2f9   : > { %v2109_v51 = vpop.f32.mrf.mxu0 }
 0x2fa   : > { %v2110_v56 = vadd.f32 %v2109_v51, %v2024_v40 }
 0x2ff   : > { %v2883_v48 = vpop.f32.mrf.mxu1 }
 0x300   : > { %v2202_v60 = vadd.f32 %v2883_v48, %v2117_v49 }
 0x301   : > { %v2193_v50 = vpop.f32.mrf.mxu1  ;;  %v2894_v53 = vpop.f32.mrf.mxu0 }
 0x302   : > { %v2194_v61 = vadd.f32 %v2193_v50, %v2110_v56  ;;  %v2291_v27 = vadd.f32 %v2894_v53, %v2202_v60 }
 0x303   : > { %v2284_v62 = vpop.f32.mrf.mxu0 }
 0x304   : > { %v2285_v34 = vadd.f32 %v2284_v62, %v2194_v61 }
 0x308   : > { %v2905_v0 = vpop.f32.mrf.mxu1 }
 0x309   : > { %v2372_v52 = vadd.f32 %v2905_v0, %v2291_v27 }
 0x30a   : > { %v2365_v59 = vpop.f32.mrf.mxu1 }
 0x30b   : > { %2376 = vst [vmem:[%s269_s20 + $0x8] sm:$0xff] %v2372_v52  ;;  %v2366_v1 = vadd.f32 %v2365_v59, %v2285_v34 }
 0x30d   : > { %2375 = vst [vmem:[%s269_s20] sm:$0xff] %v2366_v1 }
 0x30e   : > { %2964 = shalt.err (!%p2961_p3)
}
 0x30f   : > { %s2965_s16 = scalar_lea.hbm %s3659_s8, 256  ;;  %s2969_s19 = scalar_lea.hbm %s3708_s7, 512 }
 0x310   : > { %p2966_p4 = scmp.ne.s32.totalorder %s3659_s8, %s2965_s16  ;;  %p2970_p9 = scmp.lt.s32.totalorder %s3659_s8, %s3708_s7 }
 0x311   : > { %p2971_p10 = scmp.lt.s32.totalorder %s2969_s19, %s2965_s16 }
 0x312   : > { %p2967_p7 = pnand %p2966_p4, %p3096_p5 }
 0x313   : > { %p2972_p11 = por %p2971_p10, %p2970_p9 }
 0x314   : > { %p2968_p8 = pneg %p2967_p7 }
 0x316   : > { %p2973_p12 = pnand %p2972_p11, %p2968_p8 }
 0x318   : > { %2976 = shalt.err (!%p2973_p12)
}
 0x319   : > { %s3015_s23 = smov 128   ;;  %s3016_s29 = smov 256  }
 0x31a   : > { %s3017_s28 = smov 8  }
 0x31b   : > { %2906 = dma.vmem_to_hbm [thread:$0]  (%p3096_p5), %s3654_s21, 256, %s3659_s8, %s3661_s9, %s3015_s23, %s3016_s29, %s3017_s28  }
 0x31c PF: > { %p2912_p13 = scmp.ge.s32.totalorder %s3011_s27, 2  ;;  %s2405_s13 = sand.u32 1, %s2999_s24  }
 0x31d   : > { %s2406_s14 = scalar_lea.sflag [#allocation3], %s2405_s13 }
 0x31e   : > { %p2909_p0 = pnand %p2912_p13, %p3100_p6 }
 0x320   : > { %p2910_p1 = pneg %p2909_p0 }
 0x322   : > { %2994 = dma.done.wait (%p2910_p1), %s2406_s14, 256  }
 0x323   : > { %2996 = vsyncadd (%p2910_p1), %s2406_s14, 4294967040  ;;  %p17_p2 = scmp.ge.s32.totalorder %s3083_s30, 4   ;;  %s3711_s24 = smov %s3003_s25 }
 0x324   : > { %s3712_s25 = smov %s3007_s26  ;;  %s3713_s26 = smov %s3094_s10 }
 0x325   : > { %s3714_s27 = smov %s3083_s30  ;;  %19 = sbr.rel (!%p17_p2) target bundleno = 3 (0x3), region = 83 }
 0x32a   :  { %2411 = vsyncpa [#allocation3], 1 }
 0x32b   :  { %2413 = vsyncpa [#allocation3 + $0x1], 1 }

</bundles_post_ra>
